<compile_context>
chip_gen: v7x
topology: tpu7x:2x2x1
jax: 0.10.0
libtpu: 0.0.40
codegen_flags: <defaults>
</compile_context>

<pallas_src>
import functools

import numpy as np

import jax
import jax.numpy as jnp
from jax.experimental import pallas as pl
from jax.experimental.pallas import tpu as pltpu

WIN_SIZE = 3
LAMBDA_D = 1e-3
LAMBDA_C = 1e-3
EPS = 1e-8

_LANE = 128
_SUB = 8


def _cdiv(a, b):
    return -(-a // b)


def _ppl_kernel(x_ref, out_ref, *, dcp_scale, lambda_c, eps, r_valid,
                needs_mask):
    x = x_ref[0]                                      # (C, r_tile, 128)

    # Channel min/max: reductions over the *leading* C axis of lane-dense
    # (r_tile, 128) slabs -> pure elementwise VPU vreg ops, no XLU.
    min_c = jnp.min(x, axis=0).astype(jnp.float32)    # (r_tile, 128)
    max_c = jnp.max(x, axis=0).astype(jnp.float32)

    # DCP with the constant interior overlap weight (win^2) folded into
    # dcp_scale; boundary-weight corrections are added by the wrapper.
    dcp = jnp.abs(min_c) * dcp_scale

    # CAP: s = (max - min)/(max + eps), s := 0 where max == 0.  The divide is
    # an EUP approximate reciprocal refined by two Newton steps (VALU relief
    # on v7x; accurate to f32 for the 1e-4 tolerance).
    d = max_c + eps
    inv = pl.reciprocal(d, approx=True)
    inv = inv * (2.0 - d * inv)
    inv = inv * (2.0 - d * inv)
    s = (max_c - min_c) * inv
    s = jnp.where(max_c == 0.0, 0.0, s)
    cap = lambda_c * jnp.abs(max_c - s)

    contrib = dcp + cap                               # (r_tile, 128) f32

    if needs_mask:
        # The last spatial tile may run past the array; rows >= r_valid hold
        # unspecified data (ragged BlockSpec read) -> zero their contribution.
        row = jax.lax.broadcasted_iota(jnp.int32, contrib.shape, 0)
        row = row + pl.program_id(1) * contrib.shape[0]
        contrib = jnp.where(row < r_valid, contrib, 0.0)

    # Lane-dense (1, 128) partial per grid point; the small cross-sublane
    # reduce rides the (otherwise idle) XLU slot.
    out_ref[0, 0] = jnp.sum(contrib, axis=0, keepdims=True)


def _overlap_delta(size, win_size):
    """wr(i) - win_size for every index i (== 0 away from the edges)."""
    p = win_size // 2
    i = np.arange(size)
    cnt = np.minimum(i + p, size - 1) - np.maximum(i - p, 0) + 1
    return (cnt - win_size).astype(np.float32)


def _dcp_edge_correction(x, win_size):
    """sum_{pixels} |min_c| * (wr*wc - win^2), using only thin edge bands.

    DCP = sum |min_c| * wr(h) * wc(col)
        = win^2 * sum|min_c|                      (done in the kernel)
        + win * sum dr(h)*|min_c| + win * sum dc(col)*|min_c|
        + sum dr(h)*dc(col)*|min_c|               (this function, O(H+W) pixels)
    """
    p = win_size // 2
    if p == 0:
        return jnp.float32(0.0)
    N, C, H, W = x.shape
    dr = _overlap_delta(H, win_size)
    dc = _overlap_delta(W, win_size)
    r_idx = (np.arange(H) if H <= 2 * p
             else np.concatenate([np.arange(p), np.arange(H - p, H)]))
    c_idx = (np.arange(W) if W <= 2 * p
             else np.concatenate([np.arange(p), np.arange(W - p, W)]))
    dr_b = jnp.asarray(dr[r_idx])                      # (Rb,)
    dc_b = jnp.asarray(dc[c_idx])                      # (Cb,)

    xr = x[:, :, r_idx, :].astype(jnp.float32)         # (N, C, Rb, W)  tiny
    ar = jnp.abs(jnp.min(xr, axis=1))                  # (N, Rb, W)
    xc = x[:, :, :, c_idx].astype(jnp.float32)         # (N, C, H, Cb)  tiny
    ac = jnp.abs(jnp.min(xc, axis=1))                  # (N, H, Cb)
    arc = jnp.abs(jnp.min(xr[:, :, :, c_idx], axis=1)) # (N, Rb, Cb)    corners

    win = jnp.float32(win_size)
    term_r = win * jnp.sum(ar * dr_b[None, :, None])
    term_c = win * jnp.sum(ac * dc_b[None, None, :])
    term_rc = jnp.sum(arc * (dr_b[:, None] * dc_b[None, :])[None])
    return term_r + term_c + term_rc


def ppl_loss(x, lambda_d=LAMBDA_D, lambda_c=LAMBDA_C, win_size=WIN_SIZE,
             eps=EPS, tile_bytes=4 * 1024 * 1024, min_grid_steps=8):
    """Physical Prior Loss on an NCHW tensor. Returns a float32 scalar."""
    if win_size % 2 != 1:
        raise ValueError("win_size must be odd (matches the reference unfold "
                         "geometry).")
    N, C, H, W = x.shape
    S = H * W
    ebytes = jnp.dtype(x.dtype).itemsize
    sub_granule = _SUB * max(1, 4 // ebytes)   # 8 rows f32, 16 bf16, 32 int8

    # ---- lane-dense spatial view (zero-copy when S % 128 == 0) --------------
    x_flat = x.reshape(N, C, S)
    s128 = _cdiv(S, _LANE) * _LANE
    if s128 != S:
        # TODO(synk): the only remaining copy; needed for lane density when
        # H*W is not a multiple of 128.  Pad values are 0 => contribute 0.
        x_flat = jnp.pad(x_flat, ((0, 0), (0, 0), (0, s128 - S)))
    r_total = s128 // _LANE
    x_in = x_flat.reshape(N, C, r_total, _LANE)

    # ---- tile sizing: VMEM budget, dtype granule, >= min_grid_steps steps ---
    r_budget = max(1, tile_bytes // (ebytes * C * _LANE))
    want_tiles = max(1, _cdiv(min_grid_steps, max(1, N)))
    r_steps = max(1, _cdiv(r_total, want_tiles))
    r_tile = min(r_budget, r_steps, r_total)
    if r_tile < r_total:
        # Sub-full blocks must respect the dtype's sublane-packing granule.
        r_tile = min(r_total,
                     max(sub_granule, (r_tile // sub_granule) * sub_granule))
    num_tiles = _cdiv(r_total, r_tile)
    needs_mask = (num_tiles * r_tile != r_total)

    kernel = functools.partial(
        _ppl_kernel,
        dcp_scale=float(lambda_d) * float(win_size * win_size),
        lambda_c=float(lambda_c), eps=float(eps),
        r_valid=r_total, needs_mask=needs_mask)

    partials = pl.pallas_call(
        kernel,
        out_shape=jax.ShapeDtypeStruct((N, num_tiles, 1, _LANE), jnp.float32),
        grid_spec=pltpu.PrefetchScalarGridSpec(
            num_scalar_prefetch=0,
            grid=(N, num_tiles),
            in_specs=[
                # TODO(synk): sweep pipeline_mode=pl.Buffered(3) if the strided
                # per-channel block DMA ever shows up as exposed latency.
                pl.BlockSpec((1, C, r_tile, _LANE), lambda n, s: (n, 0, s, 0)),
            ],
            out_specs=pl.BlockSpec((1, 1, 1, _LANE),
                                   lambda n, s: (n, s, 0, 0)),
        ),
        compiler_params=pltpu.CompilerParams(
            dimension_semantics=("parallel", "parallel"),
            vmem_limit_bytes=48 * 1024 * 1024),
    )(x_in)

    loss = jnp.sum(partials)
    if win_size > 1:
        loss = loss + lambda_d * _dcp_edge_correction(x, win_size)
    return loss


def ppl_ref(x, win_size=WIN_SIZE, lambda_d=LAMBDA_D, lambda_c=LAMBDA_C,
            eps=EPS):
    """Pure-JAX reference mirroring the PyTorch module exactly."""
    x = x.astype(jnp.float32)
    p = win_size // 2
    xp = jnp.pad(x, ((0, 0), (0, 0), (p, p), (p, p)))
    Hp, Wp = xp.shape[2], xp.shape[3]
    H_out = Hp - win_size + 1
    W_out = Wp - win_size + 1
    patches = jnp.stack(
        [jnp.stack([xp[:, :, i:i + H_out, j:j + W_out]
                    for j in range(win_size)], axis=-1)
         for i in range(win_size)], axis=-2)            # (N,C,H,W,w,w)
    m = jnp.min(patches, axis=1)
    dcp = jnp.sum(jnp.abs(m))
    max_c = jnp.max(x, axis=1)
    min_c = jnp.min(x, axis=1)
    s = (max_c - min_c) / (max_c + eps)
    s = jnp.where(max_c == 0.0, 0.0, s)
    cap = jnp.sum(jnp.abs(max_c - s))
    return lambda_c * cap + lambda_d * dcp


if __name__ == "__main__":
    key = jax.random.PRNGKey(0)
    ks = jax.random.split(key, 5)

    def check(name, x, **kw):
        out = jax.block_until_ready(ppl_loss(x, **kw))
        ref = jax.block_until_ready(ppl_ref(x))
        if not jnp.allclose(out, ref, rtol=2e-4, atol=1e-5):
            raise AssertionError(f"mismatch ({name}): pallas={out} ref={ref}")

    # Small dehazed-image-like input: single tiny tile (full-dim block).
    check("16x16", jax.random.uniform(ks[0], (2, 3, 16, 16), dtype=jnp.float32))
    # Multi-tile pipelined path with tiny forced tiles.
    check("48x64 multi-tile",
          jax.random.uniform(ks[1], (2, 3, 48, 64), dtype=jnp.float32),
          tile_bytes=4096)
    # Ragged spatial tiling -> in-kernel row-mask path.
    check("40x64 ragged",
          jax.random.uniform(ks[2], (2, 3, 40, 64), dtype=jnp.float32))
    # H*W not a multiple of 128 -> minimal lane-pad path.
    check("30x30 lane-pad",
          jax.random.uniform(ks[3], (1, 3, 30, 30), dtype=jnp.float32))
    # bf16 input: dtype-aware sublane granule; reductions stay bf16 in VMEM.
    check("32x64 bf16",
          jax.random.uniform(ks[4], (2, 3, 32, 64), dtype=jnp.bfloat16))

    print("KERNEL_OK")
</pallas_src>

<mosaic_0001>
module attributes {stable_mosaic.version = 11 : i64} {
  func.func @_ppl_kernel(%arg0: i32, %arg1: i32, %arg2: memref<1x3x2x128xf32, #tpu.memory_space<vmem>>, %arg3: memref<1x1x1x128xf32, #tpu.memory_space<vmem>>) attributes {dimension_semantics = [#tpu.dimension_semantics<parallel>, #tpu.dimension_semantics<parallel>], iteration_bounds = array<i64: 2, 1>, scalar_prefetch = 0 : i64, scratch_operands = 0 : i64, tpu.core_type = #tpu.core_type<tc>, window_params = [{transform_indices = @transform_0, window_bounds = array<i64: 1, 3, 2, 128>}, {transform_indices = @transform_1, window_bounds = array<i64: 1, 1, 1, 128>}]} {
    %c0 = arith.constant 0 : index
    %c0_0 = arith.constant 0 : index
    %c0_1 = arith.constant 0 : index
    %c0_2 = arith.constant 0 : index
    %0 = vector.load %arg2[%c0, %c0_0, %c0_1, %c0_2] : memref<1x3x2x128xf32, #tpu.memory_space<vmem>>, vector<1x3x2x128xf32>
    %1 = vector.shape_cast %0 : vector<1x3x2x128xf32> to vector<3x2x128xf32>
    %cst = arith.constant dense<0x7F800000> : vector<2x128xf32>
    %2 = vector.multi_reduction <minimumf>, %1, %cst [0] : vector<3x2x128xf32> to vector<2x128xf32>
    %cst_3 = arith.constant dense<0xFF800000> : vector<2x128xf32>
    %3 = vector.multi_reduction <maximumf>, %1, %cst_3 [0] : vector<3x2x128xf32> to vector<2x128xf32>
    %4 = math.absf %2 : vector<2x128xf32>
    %cst_4 = arith.constant 0.00899999961 : f32
    %5 = vector.broadcast %cst_4 : f32 to vector<2x128xf32>
    %6 = arith.mulf %4, %5 : vector<2x128xf32>
    %cst_5 = arith.constant 9.99999993E-9 : f32
    %7 = vector.broadcast %cst_5 : f32 to vector<2x128xf32>
    %8 = arith.addf %3, %7 : vector<2x128xf32>
    %9 = tpu.reciprocal %8 {approx = true} : vector<2x128xf32> -> vector<2x128xf32>
    %10 = arith.mulf %8, %9 : vector<2x128xf32>
    %cst_6 = arith.constant 2.000000e+00 : f32
    %11 = vector.broadcast %cst_6 : f32 to vector<2x128xf32>
    %12 = arith.subf %11, %10 : vector<2x128xf32>
    %13 = arith.mulf %9, %12 : vector<2x128xf32>
    %14 = arith.mulf %8, %13 : vector<2x128xf32>
    %cst_7 = arith.constant 2.000000e+00 : f32
    %15 = vector.broadcast %cst_7 : f32 to vector<2x128xf32>
    %16 = arith.subf %15, %14 : vector<2x128xf32>
    %17 = arith.mulf %13, %16 : vector<2x128xf32>
    %18 = arith.subf %3, %2 : vector<2x128xf32>
    %19 = arith.mulf %18, %17 : vector<2x128xf32>
    %cst_8 = arith.constant 0.000000e+00 : f32
    %20 = vector.broadcast %cst_8 : f32 to vector<2x128xf32>
    %21 = arith.cmpf oeq, %3, %20 : vector<2x128xf32>
    %cst_9 = arith.constant 0.000000e+00 : f32
    %22 = vector.broadcast %cst_9 : f32 to vector<2x128xf32>
    %23 = arith.select %21, %22, %19 : vector<2x128xi1>, vector<2x128xf32>
    %24 = arith.subf %3, %23 : vector<2x128xf32>
    %25 = math.absf %24 : vector<2x128xf32>
    %cst_10 = arith.constant 1.000000e-03 : f32
    %26 = vector.broadcast %cst_10 : f32 to vector<2x128xf32>
    %27 = arith.mulf %26, %25 : vector<2x128xf32>
    %28 = arith.addf %6, %27 : vector<2x128xf32>
    %cst_11 = arith.constant dense<0.000000e+00> : vector<128xf32>
    %29 = vector.multi_reduction <add>, %28, %cst_11 [0] : vector<2x128xf32> to vector<128xf32>
    %30 = vector.shape_cast %29 : vector<128xf32> to vector<1x128xf32>
    %c0_12 = arith.constant 0 : index
    %c0_13 = arith.constant 0 : index
    %c0_14 = arith.constant 0 : index
    %c0_15 = arith.constant 0 : index
    %31 = vector.load %arg3[%c0_12, %c0_13, %c0_14, %c0_15] : memref<1x1x1x128xf32, #tpu.memory_space<vmem>>, vector<1x1x1x128xf32>
    %32 = vector.shape_cast %31 : vector<1x1x1x128xf32> to vector<1x128xf32>
    %33 = vector.shape_cast %30 : vector<1x128xf32> to vector<1x1x1x128xf32>
    tpu.vector_store %arg3[%c0_12, %c0_13, %c0_14, %c0_15], %33 {strides = array<i32>} : memref<1x1x1x128xf32, #tpu.memory_space<vmem>>, vector<1x1x1x128xf32>,
    return
  }
  func.func @transform_0(%arg0: i32, %arg1: i32) -> (i32, i32, i32, i32) {
    %c0_i32 = arith.constant 0 : i32
    %c0_i32_0 = arith.constant 0 : i32
    %c0_i32_1 = arith.constant 0 : i32
    return %arg0, %c0_i32, %arg1, %c0_i32_0 : i32, i32, i32, i32
  }
  func.func @transform_1(%arg0: i32, %arg1: i32) -> (i32, i32, i32, i32) {
    %c0_i32 = arith.constant 0 : i32
    %c0_i32_0 = arith.constant 0 : i32
    %c0_i32_1 = arith.constant 0 : i32
    return %arg0, %arg1, %c0_i32, %c0_i32_0 : i32, i32, i32, i32
  }
}

</mosaic_0001>

<bundles_post_ra>
// kernel: tpu_custom_call.1
= control target key start
LH: loop header
LB: loop body
LE: loop exit
PB: predicated region body
PF: predicated region fallthrough
CT: control target
= control target key end

     0   :  { %6 = vsyncpa [#allocation3], 0  ;;  %s669_s0 = inlined_call_operand.hbm [shape: f32[2,3,2,128], index: 0, kind: input, shape index: {}]   ;;  %s670_s1 = inlined_call_operand.hbm [shape: f32[2,1,1,128], index: 1, kind: output, shape index: {}]  }
   0x1   :  { %8 = vsyncpa [#allocation3 + $0x1], 0 }
   0x2   :  { %9 = vsyncpa [#allocation4], 0 }
   0x3   :  { %11 = vsyncpa [#allocation4 + $0x1], 0  ;;  %s488_s6 = smov 0   ;;  %s490_s7 = smov 0  }
   0x4   :  { %s492_s8 = smov 0   ;;  %s494_s9 = smov 0  }
   0x5   :  { %s496_s10 = smov 0   ;;  %s498_s11 = smov 0  }
   0x6 LB: > { %s282_s12 = sadd.s32 4294967295, %s472_s11   ;;  %s283_s13 = sadd.s32 4294967294, %s472_s11   ;;  %s472_s11 = sphi %s498_s11, %s17_s11   ;;  %s468_s10 = sphi %s496_s10, %s685_s10   ;;  %s464_s9 = sphi %s494_s9, %s684_s9   ;;  %s460_s8 = sphi %s492_s8, %s683_s8   ;;  %s456_s7 = sphi %s490_s7, %s682_s7   ;;  %s452_s6 = sphi %s488_s6, %s681_s6  }
   0x7   : > { %s29_s14 = sadd.s32 1, %s468_s10  ;;  %s38_s15 = sadd.s32 1, %s460_s8 }
   0x8   : > { %p31_p0 = scmp.ge.s32.totalorder %s29_s14, 2  ;;  %p45_p1 = scmp.ne.s32.totalorder %s460_s8, %s456_s7 }
   0x9   : > { %p46_p2 = scmp.eq.s32.totalorder %s472_s11, 0  ;;  %p51_p3 = scmp.ne.s32.totalorder %s456_s7, %s452_s6 }
   0xa   : > { %s687_s14 = smov (%p31_p0, %s29_s14), 0  ;;  %p52_p5 = scmp.eq.s32.totalorder %s282_s12, 0 }
   0xb   : > { %p529_p4 = por %p46_p2, %p45_p1  ;;  %s33_s17 = ssub.s32 %s468_s10, %s687_s14 }
   0xc   : > { %p77_p6 = scmp.eq.s32.totalorder %s282_s12, 1  ;;  %p36_p7 = scmp.eq.s32.totalorder %s33_s17, 0 }
   0xd   : > { %p535_p8 = por %p52_p5, %p51_p3  ;;  %p83_p10 = scmp.eq.s32.totalorder %s283_s13, 1 }
   0xe   : > { %p539_p9 = por %p77_p6, %p45_p1  ;;  %p306_p13 = scmp.lt.s32.totalorder %s472_s11, 2 }
   0xf   : > { %s544_s20 = scalar_select %p36_p7, %s460_s8, %s38_s15  }
  0x10   : > { %s674_s19 = scalar_select %p539_p9, 1, 0 }
  0x11   : > { %p546_p11 = por %p83_p10, %p51_p3  ;;  %s103_s22 = sand.u32 1, %s460_s8  }
  0x12   : > { %s291_s23 = smul.u32 6, %s103_s22  ;;  %p556_p0 = pnand %p306_p13, %p529_p4 }
  0x13   : > { %s675_s21 = scalar_select %p546_p11, 1, 0 }
  0x14   : > { %s292_s24 = smul.u32 96, %s468_s10  ;;  %s107_s29 = scalar_lea.vmem [#allocation2], %s291_s23 }
  0x15   : > { %s115_s30 = sshll.u32 %s107_s29, 4  ;;  %s568_s2 = scalar_lea.sflag [#allocation3], %s103_s22  ;;  %s565_s30 = int_to_ptr.vmem [resolvable:$true] %s115_s30 }
  0x16   : > { %s563_s28 = scalar_lea.hbm %s669_s0, %s292_s24  ;;  %p362_p3 = pneg %p556_p0 }
  0x17   : > { %s360_s3 = scalar_lea.hbm %s563_s28, 96  ;;  %s365_s12 = scalar_lea.hbm %s669_s0, 192 }
  0x18   : > { %p361_p2 = scmp.ne.s32.totalorder %s563_s28, %s360_s3  ;;  %p366_p6 = scmp.lt.u32.totalorder %s563_s28, %s669_s0 }
  0x19   : > { %p367_p7 = scmp.lt.u32.totalorder %s365_s12, %s360_s3  ;;  %p369_p13 = scmp.lt.u32.totalorder %s360_s3, %s563_s28 }
  0x1a   : > { %p363_p4 = pnand %p362_p3, %p361_p2 }
  0x1b   : > { %p368_p10 = por %p367_p7, %p366_p6 }
  0x1c   : > { %p364_p5 = pneg %p363_p4 }
  0x1d   : > { %p370_p12 = por %p369_p13, %p368_p10 }
  0x1f   : > { %p371_p1 = pnand %p370_p12, %p364_p5 }
  0x21   : > { %374 = shalt.err (!%p371_p1)
}
  0x22   : > { %s375_s16 = scalar_lea.vmem %s565_s30, 96  ;;  %s474_s17 = smov [#allocation2]  }
  0x23   : > { %p376_p2 = scmp.ne.s32.totalorder %s565_s30, %s375_s16  ;;  %s380_s22 = sshll.u32 %s474_s17, 4  ;;  %s381_s22 = int_to_ptr.vmem [resolvable:$false] %s380_s22 }
  0x24   : > { %s382_s23 = scalar_lea.vmem %s381_s22, 192  ;;  %p383_p9 = scmp.lt.s32.totalorder %s565_s30, %s381_s22 }
  0x25   : > { %p378_p4 = pnand %p376_p2, %p362_p3  ;;  %p384_p6 = scmp.lt.s32.totalorder %s382_s23, %s375_s16 }
  0x27   : > { %p379_p11 = pneg %p378_p4  ;;  %p385_p7 = por %p384_p6, %p383_p9 }
  0x29   : > { %p386_p10 = pnand %p385_p7, %p379_p11 }
  0x2b   : > { %389 = shalt.err (!%p386_p10)
}
  0x2c   : > { %s475_s24 = smov 32   ;;  %s476_s26 = smov 2  }
  0x2d   : > { %301 = dma.hbm_to_vmem [thread:$0]  (!%p556_p0), %s563_s28, 96, %s565_s30, %s568_s2, %s475_s24, %s475_s24, %s476_s26  }
  0x2e   : > { %p123_p12 = scmp.lt.s32.totalorder %s472_s11, 3  ;;  %p677_p1 = scmp.ge.s32.totalorder %s472_s11, 1 }
  0x30   : > { %p124_p3 = pnand %p677_p1, %p123_p12 }
  0x31   : > { %s600_s27 = sand.u32 (!%p124_p3), 1, %s456_s7  }
  0x32   : > { %127 = sbr.rel (%p124_p3) target bundleno = 127 (0x7f), region = 24  ;;  %s130_s3 = scalar_lea.sflag (!%p124_p3), [#allocation3], %s600_s27 }
  0x33   : > { %s293_s29 = smul.u32 (!%p124_p3), 6, %s600_s27 }
  0x35   : > { %s133_s4 = scalar_lea.vmem (!%p124_p3), [#allocation2], %s293_s29 }
  0x39   : > { %443 = dma.done.wait (%p535_p8), %s130_s3, 96  }
  0x3a   : > { %445 = vsyncadd (%p535_p8), %s130_s3, 4294967200  ;;  %vm154_vm0 = vcmask 1041408   ;;  %v151_v0 = vld [vmem:[%s133_s4] sm:$0x3]  ;;  %v152_v1 = vld [vmem:[%s133_s4 + $0x2] sm:$0x3] }
  0x3b   : > { %v153_v2 = vld [vmem:[%s133_s4 + $0x4] sm:$0x3]  ;;  %v160_v3 = vsel %vm154_vm0, %v151_v0, -inf  ;;  %v161_v4 = vsel %vm154_vm0, %v152_v1, -inf  ;;  %v155_v9 = vsel %vm154_vm0, %v151_v0, inf  ;;  %v156_v10 = vsel %vm154_vm0, %v152_v1, inf }
  0x3c   : > { %v162_v5 = vsel %vm154_vm0, %v153_v2, -inf  ;;  %v163_v6 = vmax.f32 %v160_v3, %v161_v4  ;;  %v158_v12 = vmin.f32 %v155_v9, %v156_v10  ;;  %v157_v14 = vsel %vm154_vm0, %v153_v2, inf  ;;  %s150_s18 = scalar_lea.vmem [#allocation5], %s600_s27  ;;  %s288_s28 = sshll.u32 %s464_s9, 4 }
  0x3d   : > { %s205_s25 = sshll.u32 %s150_s18, 4  ;;  %s622_s5 = scalar_lea.hbm %s670_s1, %s288_s28  ;;  %s617_s25 = int_to_ptr.vmem [resolvable:$true] %s205_s25 }
  0x3e   : > { %v164_v7 = vmax.f32 %v163_v6, %v162_v5  ;;  %v159_v16 = vmin.f32 %v158_v12, %v157_v14  ;;  %s192_s12 = scalar_lea.sflag [#allocation4], %s600_s27  ;;  %s390_s13 = scalar_lea.vmem %s617_s25, 16 }
  0x3f   : > { %p391_p8 = scmp.ne.s32.totalorder %s617_s25, %s390_s13  ;;  %p678_p9 = scmp.ne.s32.totalorder %s674_s19, 0 }
  0x40   : > { %v167_v8 = vadd.f32 1e-08, %v164_v7  ;;  %v175_v20 = vsub.f32 %v164_v7, %v159_v16  ;;  %vm177_vm1 = vcmp.eq.f32.partialorder %v164_v7, 0.0  ;;  %v165_v23 = vand.u32 2147483647, %v159_v16  ;;  %s477_s9 = smov [#allocation5]  }
  0x41   : > { %p392_p11 = pnand %p391_p8, %p678_p9  ;;  %s394_s15 = sshll.u32 %s477_s9, 4  ;;  %s395_s15 = int_to_ptr.vmem [resolvable:$false] %s394_s15 }
  0x42   : > { %358 = vrcp.f32 %v167_v8  ;;  %v166_v26 = vmul.f32 0.009, %v165_v23  ;;  %s396_s16 = scalar_lea.vmem %s395_s15, 32  ;;  %p397_p5 = scmp.lt.s32.totalorder %s617_s25, %s395_s15 }
  0x43   : > { %p393_p0 = pneg %p392_p11  ;;  %p398_p13 = scmp.lt.s32.totalorder %s396_s16, %s390_s13 }
  0x45   : > { %p399_p2 = por %p398_p13, %p397_p5 }
  0x47   : > { %p400_p4 = pnand %p399_p2, %p393_p0 }
  0x4c   : > { %v359_v11 = vpop.eup %358 }
  0x4d   : > { %v169_v13 = vmul.f32 %v359_v11, %v167_v8 }
  0x4f   : > { %v170_v15 = vsub.f32 2.0, %v169_v13 }
  0x51   : > { %v171_v17 = vmul.f32 %v359_v11, %v170_v15 }
  0x53   : > { %v172_v18 = vmul.f32 %v171_v17, %v167_v8 }
  0x55   : > { %v173_v19 = vsub.f32 2.0, %v172_v18 }
  0x57   : > { %v174_v21 = vmul.f32 %v173_v19, %v171_v17 }
  0x59   : > { %v176_v22 = vmul.f32 %v175_v20, %v174_v21 }
  0x5b   : > { %v178_v24 = vsel %vm177_vm1, 0.0, %v176_v22 }
  0x5c   : > { %v179_v25 = vsub.f32 %v164_v7, %v178_v24 }
  0x5e   : > { %v180_v27 = vand.u32 2147483647, %v179_v25 }
  0x60   : > { %v181_v28 = vmul.f32 0.001, %v180_v27 }
  0x62   : > { %v182_v29 = vadd.f32 %v181_v28, %v166_v26 }
  0x64   : > { %v183_v30 = vsel %vm154_vm0, %v182_v29, 0.0 }
  0x65   : > { %v184_v31 = vrot.slane %v183_v30, 4 }
  0x67   : > { %v185_v32 = vadd.f32 %v184_v31, %v183_v30 }
  0x69   : > { %v186_v33 = vrot.slane %v185_v32, 2 }
  0x6b   : > { %v187_v34 = vadd.f32 %v186_v33, %v185_v32 }
  0x6d   : > { %v188_v35 = vrot.slane %v187_v34, 1 }
  0x6f   : > { %v189_v36 = vadd.f32 %v188_v35, %v187_v34 }
  0x71   : > { %190 = vst [vmem:[%s150_s18] sm:$0x1] %v189_v36 }
  0x72   : > { %403 = shalt.err (!%p400_p4)
}
  0x73   : > { %s404_s17 = scalar_lea.hbm %s622_s5, 16  ;;  %s408_s24 = scalar_lea.hbm %s670_s1, 32 }
  0x74   : > { %p405_p6 = scmp.ne.s32.totalorder %s622_s5, %s404_s17  ;;  %p409_p12 = scmp.lt.u32.totalorder %s622_s5, %s670_s1 }
  0x75   : > { %p410_p1 = scmp.lt.u32.totalorder %s408_s24, %s404_s17  ;;  %p412_p8 = scmp.lt.u32.totalorder %s404_s17, %s622_s5 }
  0x76   : > { %p406_p7 = pnand %p405_p6, %p678_p9 }
  0x77   : > { %p411_p3 = por %p410_p1, %p409_p12 }
  0x78   : > { %p407_p10 = pneg %p406_p7 }
  0x79   : > { %p413_p11 = por %p412_p8, %p411_p3 }
  0x7b   : > { %p414_p0 = pnand %p413_p11, %p407_p10 }
  0x7d   : > { %417 = shalt.err (!%p414_p0)
}
  0x7e   : > { %296 = dma.vmem_to_hbm [thread:$0]  (%p678_p9), %s617_s25, 16, %s622_s5, %s192_s12  }
  0x7f PF: > { %s217_s29 = sand.u32 1, %s452_s6   ;;  %p679_p5 = scmp.ne.s32.totalorder %s675_s21, 0 }
  0x80   : > { %p680_p13 = scmp.ge.s32.totalorder %s472_s11, 2  ;;  %s218_s3 = scalar_lea.sflag [#allocation4], %s217_s29 }
  0x82   : > { %p303_p2 = pnand %p680_p13, %p679_p5 }
  0x84   : > { %447 = dma.done.wait (!%p303_p2), %s218_s3, 16  }
  0x85   : > { %449 = vsyncadd (!%p303_p2), %s218_s3, 4294967280  ;;  %s17_s11 = sadd.s32 1, %s472_s11   ;;  %s681_s6 = smov %s456_s7 }
  0x86   : > { %p14_p4 = scmp.ge.s32.totalorder %s17_s11, 4   ;;  %s682_s7 = smov %s460_s8 }
  0x87   : > { %s683_s8 = smov %s544_s20  ;;  %s684_s9 = smov %s468_s10 }
  0x88   : > { %s685_s10 = smov %s687_s14  ;;  %16 = sbr.rel (!%p14_p4) target bundleno = 6 (0x6), region = 69 }
  0x8f   :  { %222 = vsyncpa [#allocation3], 1 }
  0x90   :  { %224 = vsyncpa [#allocation3 + $0x1], 1 }
  0x91   :  { %225 = vsyncpa [#allocation4], 1 }
  0x92   :  { %227 = vsyncpa [#allocation4 + $0x1], 1 }

</bundles_post_ra>
